<compile_context>
chip_gen: v5e
topology: v5e:2x2
jax: 0.10.0
libtpu: 0.0.40
codegen_flags: <defaults>
</compile_context>

<pallas_src>
import math
import functools

import jax
import jax.numpy as jnp
from jax import lax
from jax.experimental import pallas as pl
from jax.experimental.pallas import tpu as pltpu


def _mha_kernel(x_ref, w_qkv_ref, b_qkv_ref, w_proj_ref, b_proj_ref,
                o_ref, acc_ref, *, head_dim, tq, tk, compute_dtype):
    """One grid step = (batch b, query tile qi, head h).

    x_ref:      (1, T, C)    full sequence for batch b (re-fetched only when b changes)
    w_qkv_ref:  (1, 3, C, D) head h's Q/K/V projections (Q pre-scaled by 1/sqrt(D))
    b_qkv_ref:  (1, 3, 1, D) head h's Q/K/V biases (f32, Q pre-scaled)
    w_proj_ref: (1, D, C)    head h's rows of W_proj^T
    b_proj_ref: (1, C)       output-projection bias (f32)
    o_ref:      (1, TQ, C)   output tile (written once, at the last head)
    acc_ref:    (TQ, C) f32  output-projection accumulator across the head axis
    """
    qi = pl.program_id(1)
    h = pl.program_id(2)
    D = head_dim

    # ---- Q projection for this query tile / head (softmax scale already folded
    # into the weights/bias by the wrapper). MXU matmul, f32 accumulation.
    q_start = pl.multiple_of(qi * tq, tq)
    x_q = x_ref[0, pl.ds(q_start, tq), :]                                # (TQ, C)
    q = (jnp.dot(x_q, w_qkv_ref[0, 0], preferred_element_type=jnp.float32)
         + b_qkv_ref[0, 0]).astype(compute_dtype)                        # (TQ, D)

    # Query-row ids, reused by every KV tile's causal mask (no (T,T) mask).
    q_row = q_start + lax.broadcasted_iota(jnp.int32, (tq, tk), 0)

    # ---- flash-style online softmax over causal KV tiles.
    def kv_step(kv, carry):
        m_i, l_i, acc = carry
        kv_start = pl.multiple_of(kv * tk, tk)
        x_kv = x_ref[0, pl.ds(kv_start, tk), :]                          # (TK, C)
        k_t = (jnp.dot(x_kv, w_qkv_ref[0, 1], preferred_element_type=jnp.float32)
               + b_qkv_ref[0, 1]).astype(compute_dtype)                  # (TK, D)
        v_t = (jnp.dot(x_kv, w_qkv_ref[0, 2], preferred_element_type=jnp.float32)
               + b_qkv_ref[0, 2]).astype(compute_dtype)                  # (TK, D)

        # scores = q @ k^T (contract last dims — no explicit transpose).
        s = lax.dot_general(q, k_t, (((1,), (1,)), ((), ())),
                            preferred_element_type=jnp.float32)          # (TQ, TK)
        kv_col = kv_start + lax.broadcasted_iota(jnp.int32, (tq, tk), 1)
        s = jnp.where(kv_col <= q_row, s, -jnp.inf)

        m_new = jnp.maximum(m_i, jnp.max(s, axis=-1, keepdims=True))
        alpha = jnp.exp(m_i - m_new)
        p = jnp.exp(s - m_new)
        l_new = alpha * l_i + jnp.sum(p, axis=-1, keepdims=True)
        acc_new = alpha * acc + jnp.dot(p.astype(compute_dtype), v_t,
                                        preferred_element_type=jnp.float32)
        return m_new, l_new, acc_new

    m0 = jnp.full((tq, 1), -jnp.inf, jnp.float32)
    l0 = jnp.zeros((tq, 1), jnp.float32)
    a0 = jnp.zeros((tq, D), jnp.float32)
    # Causal tile skip: query tile qi only attends to KV tiles 0..qi (TK == TQ),
    # so fully-masked tiles never cost matmul / exp / PV work.
    _, l_i, acc = lax.fori_loop(0, qi + 1, kv_step, (m0, l0, a0))

    # Exact normalization (the diagonal is always unmasked, so l_i > 0).
    y_h = (acc / l_i).astype(compute_dtype)                              # (TQ, D)

    # ---- per-head contribution to the output projection, accumulated across
    # the head grid axis (init / accumulate / finalize).
    contrib = jnp.dot(y_h, w_proj_ref[0],
                      preferred_element_type=jnp.float32)                # (TQ, C)

    @pl.when(h == 0)
    def _():
        acc_ref[...] = jnp.zeros_like(acc_ref)

    acc_ref[...] += contrib

    @pl.when(h == pl.num_programs(2) - 1)
    def _():
        o_ref[0] = (acc_ref[...] + b_proj_ref[...]).astype(o_ref.dtype)


def mha_forward(x, w_attn, b_attn, w_proj, b_proj, n_head, *, q_tile=256):
    """Causal MHA forward.

    x: (B, T, C); w_attn: (3C, C); b_attn: (3C,); w_proj: (C, C); b_proj: (C,).
    For real model sizes pass x (and weights) in bf16: the MXU matmuls run in
    the input dtype with f32 accumulation; softmax math stays f32 (v5e has no
    bf16 VPU/EUP).
    """
    B, T, C = x.shape
    assert C % n_head == 0, "n_embd must be divisible by n_head"
    H = n_head
    D = C // H
    scale = 1.0 / math.sqrt(D)

    # Query/KV tile size; TQ == TK keeps the causal tile skip a simple qi+1 bound.
    # TODO(synk): support T not divisible by the tile (BoundedSlice / padding)
    # instead of falling back to a single full-T tile.
    TQ = q_tile if (T > q_tile and T % q_tile == 0) else T
    if TQ < T:
        assert TQ % 8 == 0

    # --- One-time parameter re-layouts (store these at init in a real model).
    # Per-head QKV projections, transposed for x @ W, with the 1/sqrt(D) scale
    # folded into the Q weights and bias.
    w_q = w_attn[0:C].reshape(H, D, C) * scale
    w_k = w_attn[C:2 * C].reshape(H, D, C)
    w_v = w_attn[2 * C:3 * C].reshape(H, D, C)
    w_qkv_h = jnp.transpose(jnp.stack([w_q, w_k, w_v], axis=1),
                            (0, 1, 3, 2)).astype(x.dtype)                # (H,3,C,D)

    b_qkv_h = jnp.stack([b_attn[0:C].reshape(H, D) * scale,
                         b_attn[C:2 * C].reshape(H, D),
                         b_attn[2 * C:3 * C].reshape(H, D)],
                        axis=1).reshape(H, 3, 1, D).astype(jnp.float32)  # (H,3,1,D)

    # Per-head rows of W_proj^T (head h's D input features -> all C outputs).
    w_proj_h = jnp.transpose(w_proj).reshape(H, D, C).astype(x.dtype)    # (H,D,C)
    b_proj2 = b_proj.reshape(1, C).astype(jnp.float32)

    kernel = functools.partial(_mha_kernel, head_dim=D, tq=TQ, tk=TQ,
                               compute_dtype=x.dtype)

    return pl.pallas_call(
        kernel,
        out_shape=jax.ShapeDtypeStruct((B, T, C), x.dtype),
        grid_spec=pltpu.PrefetchScalarGridSpec(
            num_scalar_prefetch=0,
            # (batch, query tile): parallel (v7x dual-TC shards these);
            # head: reduction axis for the output-projection accumulator.
            grid=(B, T // TQ, H),
            in_specs=[
                pl.BlockSpec((1, T, C), lambda b, qi, h: (b, 0, 0)),        # x (full seq)
                pl.BlockSpec((1, 3, C, D), lambda b, qi, h: (h, 0, 0, 0)),  # head-h QKV W
                pl.BlockSpec((1, 3, 1, D), lambda b, qi, h: (h, 0, 0, 0)),  # head-h QKV b
                pl.BlockSpec((1, D, C), lambda b, qi, h: (h, 0, 0)),        # head-h proj rows
                pl.BlockSpec((1, C), lambda b, qi, h: (0, 0)),              # proj bias
            ],
            out_specs=pl.BlockSpec((1, TQ, C), lambda b, qi, h: (b, qi, 0)),
            scratch_shapes=[pltpu.VMEM((TQ, C), jnp.float32)],
        ),
        compiler_params=pltpu.CompilerParams(
            dimension_semantics=("parallel", "parallel", "arbitrary"),
            # 48 MiB: above the 16/32 MiB scoped defaults, with headroom under
            # v7x's 64 MiB physical VMEM. Can be raised toward ~96 MiB on
            # v5e/v6e (128 MiB parts) for larger resident tiles.
            vmem_limit_bytes=48 * 1024 * 1024,
        ),
    )(x, w_qkv_h, b_qkv_h, w_proj_h, b_proj2)


def _reference_mha(x, w_attn, b_attn, w_proj, b_proj, n_head):
    B, T, C = x.shape
    D = C // n_head
    hi = lax.Precision.HIGHEST
    qkv = jnp.einsum("btc,oc->bto", x, w_attn, precision=hi) + b_attn
    q, k, v = jnp.split(qkv, 3, axis=2)
    q = q.reshape(B, T, n_head, D).transpose(0, 2, 1, 3)
    k = k.reshape(B, T, n_head, D).transpose(0, 2, 1, 3)
    v = v.reshape(B, T, n_head, D).transpose(0, 2, 1, 3)
    att = jnp.einsum("bhqd,bhkd->bhqk", q, k, precision=hi) * (1.0 / math.sqrt(D))
    mask = jnp.tril(jnp.ones((T, T), dtype=bool))
    att = jnp.where(mask[None, None], att, -jnp.inf)
    att = jax.nn.softmax(att, axis=-1)
    y = jnp.einsum("bhqk,bhkd->bhqd", att, v, precision=hi)
    y = y.transpose(0, 2, 1, 3).reshape(B, T, C)
    return jnp.einsum("btc,oc->bto", y, w_proj, precision=hi) + b_proj


if __name__ == "__main__":
    # Config: n_embd=32, n_head=4, block_size>=T, batch=2, T=8.
    B, T, C, H = 2, 8, 32, 4

    key = jax.random.PRNGKey(0)
    kx, k1, k2, k3, k4 = jax.random.split(key, 5)

    # PyTorch-Linear-style init: U(-1/sqrt(fan_in), 1/sqrt(fan_in)).
    lim = 1.0 / math.sqrt(C)
    w_attn = jax.random.uniform(k1, (3 * C, C), jnp.float32, -lim, lim)
    b_attn = jax.random.uniform(k2, (3 * C,), jnp.float32, -lim, lim)
    w_proj = jax.random.uniform(k3, (C, C), jnp.float32, -lim, lim)
    b_proj = jax.random.uniform(k4, (C,), jnp.float32, -lim, lim)

    x = jax.random.normal(kx, (B, T, C), jnp.float32)

    out = jax.block_until_ready(mha_forward(x, w_attn, b_attn, w_proj, b_proj, H))
    ref = _reference_mha(x, w_attn, b_attn, w_proj, b_proj, H)

    assert out.shape == (B, T, C)
    # Softmax normalization is now exact; remaining tolerance only covers MXU
    # matmul rounding differences vs. the XLA reference.
    assert jnp.allclose(out, ref, atol=2e-3, rtol=2e-3), "mismatch vs reference"

    print("KERNEL_OK")
</pallas_src>

<mosaic_0001>
module attributes {stable_mosaic.version = 11 : i64} {
  func.func @_mha_kernel(%arg0: i32, %arg1: i32, %arg2: i32, %arg3: memref<1x8x32xf32, #tpu.memory_space<vmem>>, %arg4: memref<1x3x32x8xf32, #tpu.memory_space<vmem>>, %arg5: memref<1x3x1x8xf32, #tpu.memory_space<vmem>>, %arg6: memref<1x8x32xf32, #tpu.memory_space<vmem>>, %arg7: memref<1x32xf32, #tpu.memory_space<vmem>>, %arg8: memref<1x8x32xf32, #tpu.memory_space<vmem>>, %arg9: memref<8x32xf32, #tpu.memory_space<vmem>>) attributes {dimension_semantics = [#tpu.dimension_semantics<parallel>, #tpu.dimension_semantics<parallel>, #tpu.dimension_semantics<arbitrary>], iteration_bounds = array<i64: 2, 1, 4>, scalar_prefetch = 0 : i64, scratch_operands = 1 : i64, tpu.core_type = #tpu.core_type<tc>, window_params = [{transform_indices = @transform_0, window_bounds = array<i64: 1, 8, 32>}, {transform_indices = @transform_1, window_bounds = array<i64: 1, 3, 32, 8>}, {transform_indices = @transform_2, window_bounds = array<i64: 1, 3, 1, 8>}, {transform_indices = @transform_3, window_bounds = array<i64: 1, 8, 32>}, {pipeline_mode = #tpu.pipeline_mode<synchronous>, transform_indices = @transform_4, window_bounds = array<i64: 1, 32>}, {transform_indices = @transform_5, window_bounds = array<i64: 1, 8, 32>}]} {
    %c8_i32 = arith.constant 8 : i32
    %0 = arith.muli %arg1, %c8_i32 : i32
    %1 = tpu.assume_multiple %0, 8 : i32
    %c0 = arith.constant 0 : index
    %2 = arith.index_cast %1 : i32 to index
    %c0_0 = arith.constant 0 : index
    %3 = vector.load %arg3[%c0, %2, %c0_0] : memref<1x8x32xf32, #tpu.memory_space<vmem>>, vector<1x8x32xf32>
    %4 = vector.shape_cast %3 : vector<1x8x32xf32> to vector<8x32xf32>
    %c0_1 = arith.constant 0 : index
    %c0_2 = arith.constant 0 : index
    %c0_3 = arith.constant 0 : index
    %c0_4 = arith.constant 0 : index
    %5 = vector.load %arg4[%c0_1, %c0_2, %c0_3, %c0_4] : memref<1x3x32x8xf32, #tpu.memory_space<vmem>>, vector<1x1x32x8xf32>
    %6 = vector.shape_cast %5 : vector<1x1x32x8xf32> to vector<32x8xf32>
    %cst = arith.constant dense<0.000000e+00> : vector<8x8xf32>
    %7 = tpu.matmul %4, %6, %cst {dimension_numbers = #tpu.dot_dimension_numbers<[1], [0], [0], [1], [0, 0, 1, 1], [], []>} : vector<8x32xf32>, vector<32x8xf32>, vector<8x8xf32> -> vector<8x8xf32>
    %c0_5 = arith.constant 0 : index
    %c0_6 = arith.constant 0 : index
    %c0_7 = arith.constant 0 : index
    %c0_8 = arith.constant 0 : index
    %8 = vector.load %arg5[%c0_5, %c0_6, %c0_7, %c0_8] : memref<1x3x1x8xf32, #tpu.memory_space<vmem>>, vector<1x1x1x8xf32>
    %9 = vector.shape_cast %8 : vector<1x1x1x8xf32> to vector<1x8xf32>
    %10 = vector.broadcast %9 : vector<1x8xf32> to vector<8x8xf32>
    %11 = arith.addf %7, %10 : vector<8x8xf32>
    %12 = tpu.iota {dimensions = array<i32: 0>} : vector<8x8xi32>
    %13 = vector.broadcast %1 : i32 to vector<8x8xi32>
    %14 = arith.addi %13, %12 : vector<8x8xi32>
    %cst_9 = arith.constant 0xFF800000 : f32
    %15 = vector.broadcast %cst_9 : f32 to vector<8x1xf32>
    %cst_10 = arith.constant 0.000000e+00 : f32
    %16 = vector.broadcast %cst_10 : f32 to vector<8x1xf32>
    %cst_11 = arith.constant 0.000000e+00 : f32
    %17 = vector.broadcast %cst_11 : f32 to vector<8x8xf32>
    %c1_i32 = arith.constant 1 : i32
    %18 = arith.addi %arg1, %c1_i32 : i32
    %c0_i32 = arith.constant 0 : i32
    %19 = arith.subi %18, %c0_i32 : i32
    %20 = arith.addi %c0_i32, %19 : i32
    %c1_i32_12 = arith.constant 1 : i32
    %21:3 = scf.for %arg10 = %c0_i32 to %20 step %c1_i32_12 iter_args(%arg11 = %15, %arg12 = %16, %arg13 = %17) -> (vector<8x1xf32>, vector<8x1xf32>, vector<8x8xf32>)  : i32 {
      %c8_i32_24 = arith.constant 8 : i32
      %36 = arith.muli %arg10, %c8_i32_24 : i32
      %37 = tpu.assume_multiple %36, 8 : i32
      %c0_25 = arith.constant 0 : index
      %38 = arith.index_cast %37 : i32 to index
      %c0_26 = arith.constant 0 : index
      %39 = vector.load %arg3[%c0_25, %38, %c0_26] : memref<1x8x32xf32, #tpu.memory_space<vmem>>, vector<1x8x32xf32>
      %40 = vector.shape_cast %39 : vector<1x8x32xf32> to vector<8x32xf32>
      %c0_27 = arith.constant 0 : index
      %c1 = arith.constant 1 : index
      %c0_28 = arith.constant 0 : index
      %c0_29 = arith.constant 0 : index
      %41 = vector.load %arg4[%c0_27, %c1, %c0_28, %c0_29] : memref<1x3x32x8xf32, #tpu.memory_space<vmem>>, vector<1x1x32x8xf32>
      %42 = vector.shape_cast %41 : vector<1x1x32x8xf32> to vector<32x8xf32>
      %cst_30 = arith.constant dense<0.000000e+00> : vector<8x8xf32>
      %43 = tpu.matmul %40, %42, %cst_30 {dimension_numbers = #tpu.dot_dimension_numbers<[1], [0], [0], [1], [0, 0, 1, 1], [], []>} : vector<8x32xf32>, vector<32x8xf32>, vector<8x8xf32> -> vector<8x8xf32>
      %c0_31 = arith.constant 0 : index
      %c1_32 = arith.constant 1 : index
      %c0_33 = arith.constant 0 : index
      %c0_34 = arith.constant 0 : index
      %44 = vector.load %arg5[%c0_31, %c1_32, %c0_33, %c0_34] : memref<1x3x1x8xf32, #tpu.memory_space<vmem>>, vector<1x1x1x8xf32>
      %45 = vector.shape_cast %44 : vector<1x1x1x8xf32> to vector<1x8xf32>
      %46 = vector.broadcast %45 : vector<1x8xf32> to vector<8x8xf32>
      %47 = arith.addf %43, %46 : vector<8x8xf32>
      %c0_35 = arith.constant 0 : index
      %c2 = arith.constant 2 : index
      %c0_36 = arith.constant 0 : index
      %c0_37 = arith.constant 0 : index
      %48 = vector.load %arg4[%c0_35, %c2, %c0_36, %c0_37] : memref<1x3x32x8xf32, #tpu.memory_space<vmem>>, vector<1x1x32x8xf32>
      %49 = vector.shape_cast %48 : vector<1x1x32x8xf32> to vector<32x8xf32>
      %cst_38 = arith.constant dense<0.000000e+00> : vector<8x8xf32>
      %50 = tpu.matmul %40, %49, %cst_38 {dimension_numbers = #tpu.dot_dimension_numbers<[1], [0], [0], [1], [0, 0, 1, 1], [], []>} : vector<8x32xf32>, vector<32x8xf32>, vector<8x8xf32> -> vector<8x8xf32>
      %c0_39 = arith.constant 0 : index
      %c2_40 = arith.constant 2 : index
      %c0_41 = arith.constant 0 : index
      %c0_42 = arith.constant 0 : index
      %51 = vector.load %arg5[%c0_39, %c2_40, %c0_41, %c0_42] : memref<1x3x1x8xf32, #tpu.memory_space<vmem>>, vector<1x1x1x8xf32>
      %52 = vector.shape_cast %51 : vector<1x1x1x8xf32> to vector<1x8xf32>
      %53 = vector.broadcast %52 : vector<1x8xf32> to vector<8x8xf32>
      %54 = arith.addf %50, %53 : vector<8x8xf32>
      %cst_43 = arith.constant dense<0.000000e+00> : vector<8x8xf32>
      %55 = tpu.matmul %11, %47, %cst_43 {dimension_numbers = #tpu.dot_dimension_numbers<[1], [1], [0], [0], [0, 0, 1, 0], [], []>} : vector<8x8xf32>, vector<8x8xf32>, vector<8x8xf32> -> vector<8x8xf32>
      %56 = tpu.iota {dimensions = array<i32: 1>} : vector<8x8xi32>
      %57 = vector.broadcast %37 : i32 to vector<8x8xi32>
      %58 = arith.addi %57, %56 : vector<8x8xi32>
      %59 = arith.cmpi sle, %58, %14 : vector<8x8xi32>
      %cst_44 = arith.constant 0xFF800000 : f32
      %60 = vector.broadcast %cst_44 : f32 to vector<8x8xf32>
      %61 = arith.select %59, %55, %60 : vector<8x8xi1>, vector<8x8xf32>
      %cst_45 = arith.constant dense<0xFF800000> : vector<8xf32>
      %62 = vector.multi_reduction <maximumf>, %61, %cst_45 [1] : vector<8x8xf32> to vector<8xf32>
      %63 = vector.shape_cast %62 : vector<8xf32> to vector<8x1xf32>
      %64 = arith.maximumf %arg11, %63 : vector<8x1xf32>
      %65 = arith.subf %arg11, %64 : vector<8x1xf32>
      %66 = math.exp %65 : vector<8x1xf32>
      %67 = vector.broadcast %64 : vector<8x1xf32> to vector<8x8xf32>
      %68 = arith.subf %61, %67 : vector<8x8xf32>
      %69 = math.exp %68 : vector<8x8xf32>
      %70 = arith.mulf %66, %arg12 : vector<8x1xf32>
      %cst_46 = arith.constant dense<0.000000e+00> : vector<8xf32>
      %71 = vector.multi_reduction <add>, %69, %cst_46 [1] : vector<8x8xf32> to vector<8xf32>
      %72 = vector.shape_cast %71 : vector<8xf32> to vector<8x1xf32>
      %73 = arith.addf %70, %72 : vector<8x1xf32>
      %74 = vector.broadcast %66 : vector<8x1xf32> to vector<8x8xf32>
      %75 = arith.mulf %74, %arg13 : vector<8x8xf32>
      %cst_47 = arith.constant dense<0.000000e+00> : vector<8x8xf32>
      %76 = tpu.matmul %69, %54, %cst_47 {dimension_numbers = #tpu.dot_dimension_numbers<[1], [0], [0], [1], [0, 0, 1, 1], [], []>} : vector<8x8xf32>, vector<8x8xf32>, vector<8x8xf32> -> vector<8x8xf32>
      %77 = arith.addf %75, %76 : vector<8x8xf32>
      scf.yield %64, %73, %77 : vector<8x1xf32>, vector<8x1xf32>, vector<8x8xf32>
    }
    %22 = vector.broadcast %21#1 : vector<8x1xf32> to vector<8x8xf32>
    %23 = arith.divf %21#2, %22 : vector<8x8xf32>
    %c0_13 = arith.constant 0 : index
    %c0_14 = arith.constant 0 : index
    %c0_15 = arith.constant 0 : index
    %24 = vector.load %arg6[%c0_13, %c0_14, %c0_15] : memref<1x8x32xf32, #tpu.memory_space<vmem>>, vector<1x8x32xf32>
    %25 = vector.shape_cast %24 : vector<1x8x32xf32> to vector<8x32xf32>
    %cst_16 = arith.constant dense<0.000000e+00> : vector<8x32xf32>
    %26 = tpu.matmul %23, %25, %cst_16 {dimension_numbers = #tpu.dot_dimension_numbers<[1], [0], [0], [1], [0, 0, 1, 1], [], []>} : vector<8x8xf32>, vector<8x32xf32>, vector<8x32xf32> -> vector<8x32xf32>
    %c0_i32_17 = arith.constant 0 : i32
    %27 = arith.cmpi eq, %arg2, %c0_i32_17 : i32
    %28 = arith.extui %27 : i1 to i32
    %c0_i32_18 = arith.constant 0 : i32
    %29 = arith.cmpi ne, %28, %c0_i32_18 : i32
    scf.if %29 {
      %cst_24 = arith.constant 0.000000e+00 : f32
      %36 = vector.broadcast %cst_24 : f32 to vector<8x32xf32>
      %c0_25 = arith.constant 0 : index
      %c0_26 = arith.constant 0 : index
      %37 = vector.load %arg9[%c0_25, %c0_26] : memref<8x32xf32, #tpu.memory_space<vmem>>, vector<8x32xf32>
      tpu.vector_store %arg9[%c0_25, %c0_26], %36 {strides = array<i32>} : memref<8x32xf32, #tpu.memory_space<vmem>>, vector<8x32xf32>,
    } else {
    }
    %c0_19 = arith.constant 0 : index
    %c0_20 = arith.constant 0 : index
    %30 = vector.load %arg9[%c0_19, %c0_20] : memref<8x32xf32, #tpu.memory_space<vmem>>, vector<8x32xf32>
    %31 = arith.addf %30, %26 : vector<8x32xf32>
    %c0_21 = arith.constant 0 : index
    %c0_22 = arith.constant 0 : index
    %32 = vector.load %arg9[%c0_21, %c0_22] : memref<8x32xf32, #tpu.memory_space<vmem>>, vector<8x32xf32>
    tpu.vector_store %arg9[%c0_21, %c0_22], %31 {strides = array<i32>} : memref<8x32xf32, #tpu.memory_space<vmem>>, vector<8x32xf32>,
    %c3_i32 = arith.constant 3 : i32
    %33 = arith.cmpi eq, %arg2, %c3_i32 : i32
    %34 = arith.extui %33 : i1 to i32
    %c0_i32_23 = arith.constant 0 : i32
    %35 = arith.cmpi ne, %34, %c0_i32_23 : i32
    scf.if %35 {
      %c0_24 = arith.constant 0 : index
      %c0_25 = arith.constant 0 : index
      %36 = vector.load %arg9[%c0_24, %c0_25] : memref<8x32xf32, #tpu.memory_space<vmem>>, vector<8x32xf32>
      %c0_26 = arith.constant 0 : index
      %c0_27 = arith.constant 0 : index
      %37 = vector.load %arg7[%c0_26, %c0_27] : memref<1x32xf32, #tpu.memory_space<vmem>>, vector<1x32xf32>
      %38 = vector.broadcast %37 : vector<1x32xf32> to vector<8x32xf32>
      %39 = arith.addf %36, %38 : vector<8x32xf32>
      %c0_28 = arith.constant 0 : index
      %c0_29 = arith.constant 0 : index
      %c0_30 = arith.constant 0 : index
      %40 = vector.load %arg8[%c0_28, %c0_29, %c0_30] : memref<1x8x32xf32, #tpu.memory_space<vmem>>, vector<1x8x32xf32>
      %41 = vector.shape_cast %40 : vector<1x8x32xf32> to vector<8x32xf32>
      %42 = vector.shape_cast %39 : vector<8x32xf32> to vector<1x8x32xf32>
      tpu.vector_store %arg8[%c0_28, %c0_29, %c0_30], %42 {strides = array<i32>} : memref<1x8x32xf32, #tpu.memory_space<vmem>>, vector<1x8x32xf32>,
    } else {
    }
    return
  }
  func.func @transform_0(%arg0: i32, %arg1: i32, %arg2: i32) -> (i32, i32, i32) {
    %c0_i32 = arith.constant 0 : i32
    %c0_i32_0 = arith.constant 0 : i32
    %c0_i32_1 = arith.constant 0 : i32
    return %arg0, %c0_i32, %c0_i32_0 : i32, i32, i32
  }
  func.func @transform_1(%arg0: i32, %arg1: i32, %arg2: i32) -> (i32, i32, i32, i32) {
    %c0_i32 = arith.constant 0 : i32
    %c0_i32_0 = arith.constant 0 : i32
    %c0_i32_1 = arith.constant 0 : i32
    %c0_i32_2 = arith.constant 0 : i32
    return %arg2, %c0_i32, %c0_i32_0, %c0_i32_1 : i32, i32, i32, i32
  }
  func.func @transform_2(%arg0: i32, %arg1: i32, %arg2: i32) -> (i32, i32, i32, i32) {
    %c0_i32 = arith.constant 0 : i32
    %c0_i32_0 = arith.constant 0 : i32
    %c0_i32_1 = arith.constant 0 : i32
    %c0_i32_2 = arith.constant 0 : i32
    return %arg2, %c0_i32, %c0_i32_0, %c0_i32_1 : i32, i32, i32, i32
  }
  func.func @transform_3(%arg0: i32, %arg1: i32, %arg2: i32) -> (i32, i32, i32) {
    %c0_i32 = arith.constant 0 : i32
    %c0_i32_0 = arith.constant 0 : i32
    %c0_i32_1 = arith.constant 0 : i32
    return %arg2, %c0_i32, %c0_i32_0 : i32, i32, i32
  }
  func.func @transform_4(%arg0: i32, %arg1: i32, %arg2: i32) -> (i32, i32) {
    %c0_i32 = arith.constant 0 : i32
    %c0_i32_0 = arith.constant 0 : i32
    %c0_i32_1 = arith.constant 0 : i32
    return %c0_i32, %c0_i32_0 : i32, i32
  }
  func.func @transform_5(%arg0: i32, %arg1: i32, %arg2: i32) -> (i32, i32, i32) {
    %c0_i32 = arith.constant 0 : i32
    %c0_i32_0 = arith.constant 0 : i32
    return %arg0, %arg1, %c0_i32 : i32, i32, i32
  }
}

</mosaic_0001>

<bundles_post_ra>
// kernel: tpu_custom_call.1
= control target key start
LH: loop header
LB: loop body
LE: loop exit
PB: predicated region body
PF: predicated region fallthrough
CT: control target
= control target key end

     0   :  { %10 = vsyncpa [#allocation4], 0  ;;  %s1209_s0 = inlined_call_operand.vmem [shape: f32[2,8,32], index: 0, kind: input, shape index: {}]   ;;  %s1210_s1 = inlined_call_operand.vmem [shape: f32[4,3,32,8], index: 1, kind: input, shape index: {}]   ;;  %s1211_s2 = inlined_call_operand.vmem [shape: f32[4,3,1,8], index: 2, kind: input, shape index: {}]   ;;  %s1212_s3 = inlined_call_operand.vmem [shape: f32[4,8,32], index: 3, kind: input, shape index: {}]   ;;  %s1213_s4 = inlined_call_operand.vmem [shape: f32[1,32], index: 4, kind: input, shape index: {}]   ;;  %s1214_s5 = inlined_call_operand.hbm [shape: f32[2,8,32], index: 5, kind: output, shape index: {}]  }
   0x1   :  { %12 = vsyncpa [#allocation4 + $0x1], 0  ;;  %s995_s18 = smov 0   ;;  %s997_s19 = smov 0  }
   0x2   :  { %s999_s20 = smov 0   ;;  %s1001_s21 = smov 0  }
   0x3   :  { %s1003_s22 = smov 0   ;;  %s1005_s23 = smov 0  }
   0x4   :  { %s1007_s24 = smov 0   ;;  %s1009_s25 = smov 0  }
   0x5 LB: > { %s687_s26 = sadd.s32 4294967295, %s946_s25   ;;  %s688_s27 = sadd.s32 4294967294, %s946_s25   ;;  %s946_s25 = sphi %s1009_s25, %s18_s25   ;;  %s942_s24 = sphi %s1007_s24, %s1233_s24   ;;  %s938_s23 = sphi %s1005_s23, %s1232_s23   ;;  %s934_s22 = sphi %s1003_s22, %s1231_s22   ;;  %s930_s21 = sphi %s1001_s21, %s1230_s21   ;;  %s926_s20 = sphi %s999_s20, %s1229_s20   ;;  %s922_s19 = sphi %s997_s19, %s1228_s19   ;;  %s918_s18 = sphi %s995_s18, %s1227_s18  }
   0x6   : > { %s30_s28 = sadd.s32 1, %s938_s23  ;;  %s37_s29 = sadd.s32 1, %s942_s24 }
   0x7   : > { %p31_p0 = scmp.ge.s32.totalorder %s30_s28, 4  ;;  %p181_p1 = scmp.ne.s32.totalorder %s926_s20, %s922_s19 }
   0x8   : > { %p182_p2 = scmp.eq.s32.totalorder %s687_s26, 7  ;;  %p187_p4 = scmp.ne.s32.totalorder %s922_s19, %s918_s18 }
   0x9   : > { %s1235_s28 = smov (%p31_p0, %s30_s28), 0  ;;  %s1237_s29 = smov (!%p31_p0, %s37_s29), %s942_s24 }
   0xa   : > { %1217 = sst [smem:[#allocation6_spill]] %s1235_s28  ;;  %p1044_p3 = por %p182_p2, %p181_p1 }
   0xb   : > { %p39_p5 = scmp.ge.s32.totalorder %s1237_s29, 2  ;;  %p188_p6 = scmp.eq.s32.totalorder %s688_s27, 7 }
   0xc   : > { %p691_p7 = scmp.ge.s32.totalorder %s946_s25, 1  ;;  %p238_p8 = scmp.lt.s32.totalorder %s946_s25, 9 }
   0xd   : > { %s1239_s29 = smov (%p39_p5, %s1237_s29), 0  ;;  %p1054_p9 = por %p188_p6, %p187_p4 }
   0xe   : > { %1219 = sst [smem:[#allocation7_spill]] %s1239_s29  ;;  %p239_p10 = pnand %p691_p7, %p238_p8 }
   0xf   : > { %s166_s7 = ssub.s32 %s942_s24, %s1239_s29  ;;  %s171_s8 = sadd.s32 1, %s926_s20 }
  0x10   : > { %p169_p11 = scmp.eq.s32.totalorder %s166_s7, 0  ;;  %242 = sbr.rel (%p239_p10) target bundleno = 864 (0x360), region = 40 }
  0x11   : > { %s1215_s10 = sand.u32 (!%p239_p10), 1, %s922_s19   ;;  %p282_p12 = scmp.lt.s32.totalorder (!%p239_p10), %s930_s21, 3 }
  0x12   : > { %s1062_s9 = scalar_select %p169_p11, %s926_s20, %s171_s8  }
  0x13   : > { %s1068_s11 = sshll.u32 (!%p239_p10), %s1215_s10, 3  ;;  %p278_p13 = scmp.lt.s32.totalorder (!%p239_p10), %s934_s22, 1 }
  0x14   : > { %s277_s28 = scalar_lea.vmem (!%p239_p10), [#allocation3], %s1068_s11 }
  0x15   : > { %s283_s12 = scalar_select %p282_p12, %s930_s21, 3  ;;  %vm306_vm0 = vcmask 261120   ;;  %v330_v5 = vlaneseq  ;;  %v1106_v10 = vmov 0.0   ;;  %v1108_v11 = vmov 0.0  }
  0x16   : > { %s279_s13 = scalar_select %p278_p13, %s934_s22, 1  ;;  %v1110_v12 = vmov -inf  }
  0x17   : > { %s720_s14 = smul.u32 96, %s283_s12  ;;  %s695_s15 = sshll.u32 %s283_s12, 3  ;;  %v1100_v6 = vshrl.u32 %v330_v5, 7 }
  0x18   : > { %s1076_s26 = scalar_lea.vmem %s1212_s3, %s695_s15  ;;  %s693_s10 = sshll.u32 %s279_s13, 3 }
  0x19   : > { %s1081_s8 = scalar_lea.vmem %s1210_s1, %s720_s14  ;;  %s721_s29 = smul.u32 3, %s283_s12 }
  0x1a   : > { %v301_v0 = vld [vmem:[%s1081_s8 + $0x18] sm:$0xff]  ;;  %v300_v1 = vld [vmem:[%s1081_s8 + $0x10] sm:$0xff]  ;;  %v299_v2 = vld [vmem:[%s1081_s8 + $0x8] sm:$0xff]  ;;  %s1089_s15 = scalar_lea.vmem %s1209_s0, %s693_s10 }
  0x1b   : > { %322 = vmatpush.msra.mxu0 %v301_v0  ;;  %s1094_s14 = scalar_lea.vmem %s1211_s2, %s721_s29  ;;  %v298_v3 = vld [vmem:[%s1081_s8] sm:$0xff]  ;;  %s1112_s29 = smov 0  }
  0x1c   : > { %v297_v4 = vld [vmem:[%s1089_s15] sm:$0xff] }
  0x1d   : > { %323 = vmatpush.msra.mxu0 %v300_v1  ;;  %v826_v7 = vld [vmem:[%s1094_s14] ss:$0 sm:$0xff] }
  0x1f   : > { %324 = vmatpush.msra.mxu0 %v299_v2 }
  0x21   : > { %325 = vmatpush.msra.mxu0 %v298_v3 }
  0x22   : > { %696 = vmatmul.msk.f32.vlgmr.msra.gmra.mxu0 %vm306_vm0, %v297_v4 }
  0x9f   : > { %v327_v8 = vpop.f32.mrf.mxu0 }
  0xa0   : > { %v1103_v9 = vadd.f32 %v826_v7, %v327_v8 }
  0xa1 LB: >> { %v701_v13 = vld [vmem:[%s1081_s8 + $0x38] sm:$0xff]  ;;  %v700_v14 = vld [vmem:[%s1081_s8 + $0x30] sm:$0xff]  ;;  %v699_v15 = vld [vmem:[%s1081_s8 + $0x28] sm:$0xff]  ;;  %s697_s10 = sshll.u32 %s962_s29, 3  ;;  %vm410_vm1 = vcmask 64512   ;;  %v438_v25 = vand.u32 127, %v330_v5  ;;  %s962_s29 = sphi %s1112_s29, %s338_s29   ;;  %v958_v12 = vphi %v1110_v12, %v1223_v12   ;;  %v954_v11 = vphi %v1108_v11, %v1222_v11   ;;  %v950_v10 = vphi %v1106_v10, %v1221_v10  }
  0xa2   : >> { %372 = vmatpush.msra.mxu0 %v701_v13  ;;  %s345_s12 = scalar_lea.vmem %s1089_s15, %s697_s10  ;;  %v698_v16 = vld [vmem:[%s1081_s8 + $0x20] sm:$0xff]  ;;  %v707_v18 = vld [vmem:[%s1081_s8 + $0x58] sm:$0xff]  ;;  %v706_v19 = vld [vmem:[%s1081_s8 + $0x50] sm:$0xff]  ;;  %v439_v26 = vstv %s697_s10  ;;  %s338_s29 = sadd.s32 1, %s962_s29  }
  0xa3   : >> { %v346_v17 = vld [vmem:[%s345_s12] sm:$0xff]  ;;  %402 = vmatpush.msra.mxu1 %v707_v18  ;;  %v705_v20 = vld [vmem:[%s1081_s8 + $0x48] sm:$0xff]  ;;  %v440_v27 = vadd.s32 %v439_v26, %v438_v25  ;;  %p337_p0 = scmp.ge.s32.totalorder %s338_s29, 1 }
  0xa4   : >> { %373 = vmatpush.msra.mxu0 %v700_v14  ;;  %v827_v21 = vld [vmem:[%s1094_s14 + $0x1] ss:$0 sm:$0xff]  ;;  %v828_v31 = vld [vmem:[%s1094_s14 + $0x2] ss:$0 sm:$0xff]  ;;  %p714_p1 = scmp.ne.s32.totalorder (%p337_p0), %s930_s21, 0 }
  0xa5   : >> { %403 = vmatpush.msra.mxu1 %v706_v19  ;;  %v704_v24 = vld [vmem:[%s1081_s8 + $0x40] sm:$0xff]  ;;  %vm441_vm2 = vcmp.le.s32.totalorder %v440_v27, %v1100_v6 }
  0xa6   : >> { %374 = vmatpush.msra.mxu0 %v699_v15  ;;  %v498_v49 = vld [vmem:[%s1076_s26] sm:$0xff] (%p337_p0) }
  0xa7   : >> { %404 = vmatpush.msra.mxu1 %v705_v20 }
  0xa8   : >> { %375 = vmatpush.msra.mxu0 %v698_v16 }
  0xa9   : >> { %703 = vmatmul.msk.f32.vlgmr.msra.gmra.mxu0 %vm306_vm0, %v346_v17  ;;  %405 = vmatpush.msra.mxu1 %v704_v24 }
  0xaa   : >> { %709 = vmatmul.msk.f32.vlgmr.msra.gmra.mxu1 %vm306_vm0, %v346_v17  ;;  %518 = vmatpush.msra.mxu0 (%p337_p0), %v498_v49 }
 0x126   : >> { %v377_v22 = vpop.f32.mrf.mxu0 }
 0x127   : >> { %v378_v23 = vadd.f32 %v827_v21, %v377_v22  ;;  %v407_v32 = vpop.f32.mrf.mxu1 }
 0x128   : >> { %v408_v33 = vadd.f32 %v828_v31, %v407_v32 }
 0x129   : >> { %710 = vmatpush.xpose.msk.msra.mxu2 %vm410_vm1, %v378_v23 }
 0x12a   : >> { %477 = vmatpush.msra.mxu3 %v408_v33 }
 0x12c   : >> { %711 = vmatmul.msk.f32.vlgmr.msra.gmra.mxu2 %vm410_vm1, %v1103_v9 }
 0x1af   : >> { %v434_v28 = vpop.f32.mrf.mxu2 }
 0x1b0   : >> { %v442_v29 = vsel %vm441_vm2, %v434_v28, -inf }
 0x1b1   : >> { %v443_v30 = vsel %vm410_vm1, %v442_v29, -inf }
 0x1b2   : >> { %444 = vmax.xlane.f32.xlu0 %v443_v30 }
 0x225   : >> { %v445_v34 = vpop.xlane.xlu0 %444 }
 0x226   : >> { %v446_v35 = vmax.f32 %v958_v12, %v445_v34  }
 0x228   : >> { %v447_v36 = vsub.f32 %v958_v12, %v446_v35  ;;  %v450_v37 = vsub.f32 %v442_v29, %v446_v35  ;;  %v1223_v12 = vmov %v446_v35 }
 0x22a   : >> { %v451_v38 = vmul.f32 1.442695, %v450_v37  ;;  %v448_v41 = vmul.f32 1.442695, %v447_v36 }
 0x22c   : >> { %829 = vpow2.f32 %v451_v38 }
 0x22d   : >> { %831 = vpow2.f32 %v448_v41 }
 0x232   : >> { %v830_v39 = vpop.eup %829 }
 0x233   : >> { %712 = vmatmul.msk.f32.vlgmr.msra.gmra.mxu3 %vm410_vm1, %v830_v39  ;;  %v454_v40 = vsel %vm410_vm1, %v830_v39, 0.0  ;;  %v832_v42 = vpop.eup %831 }
 0x234   : >> { %455 = vadd.xlane.f32.xlu0 %v454_v40  ;;  %v453_v43 = vmul.f32 %v954_v11, %v832_v42  ;;  %v458_v46 = vmul.f32 %v950_v10, %v832_v42 }
 0x2a7   : >> { %v456_v44 = vpop.xlane.xlu0 %455 }
 0x2a8   : >> { %v457_v45 = vadd.f32 %v456_v44, %v453_v43  }
 0x2aa   : >> { %v1222_v11 = vmov %v457_v45  ;;  %833 = vrcp.f32 (%p337_p0), %v457_v45  ;;  %v494_v52 = vand.u32 (%p337_p0), 2147483648, %v457_v45  ;;  %vm488_vm3 = vweird.f32 (%p337_p0), %v457_v45 }
 0x2ab   : > { %v492_v54 = vand.u32 (%p337_p0), 2147483647, %v457_v45 }
 0x2ac   : > { %v495_v56 = vor.u32 (%p337_p0), 1.1754944e-38, %v494_v52 }
 0x2ad   : > { %vm493_vm6 = vcmp.eq.f32.partialorder (%p337_p0), %v492_v54, 8.507059e+37 }
 0x2b0   : > { %v834_v50 = vpop.eup (%p337_p0), %833 }
 0x2b1   : > { %v484_v51 = vmul.f32 (%p337_p0), %v834_v50, %v457_v45  ;;  %vm489_vm4 = vweird.f32 (%p337_p0), %v834_v50 }
 0x2b2   : > { %vm490_vm5 = vmor (%p337_p0), %vm488_vm3, %vm489_vm4 }
 0x2b3   : > { %v485_v53 = vsub.f32 (%p337_p0), 1.0, %v484_v51 }
 0x2b5   : > { %340 = sbr.rel (!%p337_p0) target bundleno = 161 (0xa1), region = 105  ;;  %v486_v55 = vmul.f32 (%p337_p0), %v834_v50, %v485_v53 }
 0x2b6   : >> { %v479_v47 = vpop.f32.mrf.mxu3 }
 0x2b7   : >> { %v482_v48 = vadd.f32 %v479_v47, %v458_v46   ;;  %v487_v57 = vadd.f32 (%p337_p0), %v834_v50, %v486_v55 }
 0x2b9   : >> { %v1221_v10 = vmov %v482_v48  ;;  %v491_v58 = vsel (%p337_p0), %vm490_vm5, %v834_v50, %v487_v57 }
 0x2ba   : > { %v496_v59 = vsel %vm493_vm6, %v495_v56, %v491_v58 }
 0x2bb   : > { %v497_v60 = vmul.f32 %v496_v59, %v482_v48 }
 0x2bd   : > { %713 = vmatmul.msk.f32.vlgmr.msra.gmra.mxu0 %vm410_vm1, %v497_v60 }
 0x336   : > { %526 = sbr.rel (%p714_p1) target bundleno = 829 (0x33d), region = 51 }
 0x33a   : > { %v520_v61 = vpop.f32.mrf.mxu0 }
 0x33b   : > { %v964_v62 = vmov 0.0  }
 0x33c   : > { %527 = vst.msk [vmem:[#allocation2] sm:$0xff] %vm306_vm0, %v964_v62 }
 0x33d PF: > { %p715_p2 = scmp.ne.s32.totalorder %s930_s21, 3 }
 0x342   : > { %534 = sbr.rel (%p715_p2) target bundleno = 849 (0x351), region = 55 }
 0x343   : > { %v528_v63 = vld [vmem:[#allocation2] sm:$0xff] }
 0x344   : > { %v529_v0 = vadd.f32 %v528_v63, %v520_v61 }
 0x346   : > { %530 = vst.msk [vmem:[#allocation2] sm:$0xff] %vm306_vm0, %v529_v0 }
 0x347   : > { %v835_v2 = vld [vmem:[%s1213_s4] ss:$0 sm:$0xff] }
 0x34d   : > { %v535_v1 = vld [vmem:[#allocation2] sm:$0xff] }
 0x34e   : > { %v540_v3 = vadd.f32 %v835_v2, %v535_v1 }
 0x350   : > { %541 = vst.msk [vmem:[%s277_s28] sm:$0xff] %vm306_vm0, %v540_v3 }
 0x351 PF: > { %s717_s7 = sshll.u32 %s934_s22, 3  ;;  %s556_s15 = sshll.u32 %s277_s28, 4  ;;  %s557_s15 = int_to_ptr.vmem [resolvable:$true] %s556_s15 }
 0x352   : > { %s554_s21 = scalar_lea.hbm %s1214_s5, %s717_s7  ;;  %s1224_s27 = sand.u32 1, %s922_s19  }
 0x353   : > { %s558_s17 = sshll.u32 %s554_s21, 4  ;;  %s543_s14 = scalar_lea.sflag [#allocation4], %s1224_s27  ;;  %s559_s17 = int_to_ptr.hbm [resolvable:$true] %s558_s17 }
 0x354   : > { %s850_s29 = sshra.s32 %s559_s17, 4  ;;  %s856_s13 = scalar_lea.hbm %s1214_s5, 16  ;;  %s851_s29 = int_to_ptr.hbm [resolvable:$true] %s850_s29 }
 0x355   : > { %s852_s10 = scalar_lea.hbm %s851_s29, 8  ;;  %p857_p7 = scmp.lt.s32.totalorder %s851_s29, %s1214_s5 }
 0x356   : > { %p853_p4 = scmp.ne.s32.totalorder %s851_s29, %s852_s10  ;;  %p858_p8 = scmp.lt.s32.totalorder %s856_s13, %s852_s10 }
 0x358   : > { %p854_p5 = pnand %p853_p4, %p1044_p3  ;;  %p859_p10 = por %p858_p8, %p857_p7 }
 0x35a   : > { %p855_p6 = pneg %p854_p5 }
 0x35c   : > { %p860_p11 = pnand %p859_p10, %p855_p6 }
 0x35e   : > { %863 = shalt.err (!%p860_p11)
}
 0x35f   : > { %722 = dma.vmem_to_hbm [thread:$0]  (%p1044_p3), %s557_s15, 128, %s559_s17, %s543_s14  }
 0x360 PF: > { %p728_p12 = scmp.ge.s32.totalorder %s946_s25, 2  ;;  %s570_s11 = sand.u32 1, %s918_s18  }
 0x361   : > { %s571_s28 = scalar_lea.sflag [#allocation4], %s570_s11 }
 0x362   : > { %p725_p13 = pnand %p728_p12, %p1054_p9 }
 0x364   : > { %p726_p0 = pneg %p725_p13 }
 0x366   : > { %913 = dma.done.wait (%p726_p0), %s571_s28, 128  }
 0x367   : > { %915 = vsyncadd (%p726_p0), %s571_s28, 4294967168  ;;  %s18_s25 = sadd.s32 1, %s946_s25   ;;  %s1225_s30 = sld [smem:[#allocation6_spill]] }
 0x368   : > { %p15_p1 = scmp.ge.s32.totalorder %s18_s25, 10   ;;  %s1226_s8 = sld [smem:[#allocation7_spill]] }
 0x369   : > { %s1227_s18 = smov %s922_s19  ;;  %s1228_s19 = smov %s926_s20 }
 0x36a   : > { %s1229_s20 = smov %s1062_s9  ;;  %s1230_s21 = smov %s938_s23 }
 0x36b   : > { %s1231_s22 = smov %s942_s24  ;;  %17 = sbr.rel (!%p15_p1) target bundleno = 5 (0x5), region = 116 }
 0x36d   : > { %s1232_s23 = smov %s1225_s30 }
 0x36e   : > { %s1233_s24 = smov %s1226_s8 }
 0x370   :  { %577 = vsyncpa [#allocation4], 1 }
 0x371   :  { %579 = vsyncpa [#allocation4 + $0x1], 1 }

</bundles_post_ra>
